<compile_context>
chip_gen: v6e
topology: v6e:2x2x1
jax: 0.10.0
libtpu: 0.0.40
codegen_flags: <defaults>
</compile_context>

<pallas_src>
import jax
import jax.numpy as jnp
from jax.experimental import pallas as pl
from jax.experimental.pallas import tpu as pltpu


def _round_up(x, m):
    return ((x + m - 1) // m) * m


def mlp_kernel(x_ref, w1_ref, b1_ref, w2_ref, b2_ref, out_ref):
    # fc1: (TB, D_in) @ (D_in, H_pad) -> f32 accumulate, + bias, ReLU
    h = jnp.dot(x_ref[...], w1_ref[...], preferred_element_type=jnp.float32)
    h = h + b1_ref[...]                 # (1, H_pad) broadcast over batch rows
    h = jnp.maximum(h, 0.0)             # ReLU (padded cols stay exactly 0)
    # fc2: cast back to the compute dtype for the second MXU pass
    h = h.astype(w2_ref.dtype)
    q = jnp.dot(h, w2_ref[...], preferred_element_type=jnp.float32)
    q = q + b2_ref[...]
    out_ref[...] = q.astype(out_ref.dtype)


def network_forward(state, w1, b1, w2, b2, *, tile_b=256,
                    compute_dtype=jnp.bfloat16):
    """Pallas implementation of Network.forward.

    state: (B, input_size) float32
    w1:    (input_size, 30) float32   (transposed PyTorch fc1.weight)
    b1:    (30,) float32
    w2:    (30, nb_action) float32    (transposed PyTorch fc2.weight)
    b2:    (nb_action,) float32
    returns q_values: (B, nb_action) float32
    """
    B, d_in = state.shape
    hidden = w1.shape[1]
    nb_action = w2.shape[1]

    LANE = 128
    h_pad = _round_up(max(hidden, LANE), LANE)
    a_pad = _round_up(max(nb_action, LANE), LANE)

    # Batch tile: multiple of 16 (bf16 sublane packing); largest tile up to
    # `tile_b` that keeps the grid non-degenerate.  Even TB=2048 is only a few
    # MiB of VMEM with double-buffering, so v7x's 64 MiB budget is loose here.
    tb = min(tile_b, _round_up(B, 16))
    tb = _round_up(tb, 16)
    b_pad = _round_up(B, tb)

    f32 = jnp.float32
    cdt = compute_dtype

    # Zero-pad + cast.  Zero padding is inert: ReLU(0)=0 and zero rows/cols of
    # w2/b2 contribute 0 to the (sliced-off) outputs.
    x_p = jnp.zeros((b_pad, d_in), cdt).at[:B, :].set(state.astype(cdt))
    w1_p = jnp.zeros((d_in, h_pad), cdt).at[:, :hidden].set(w1.astype(cdt))
    b1_p = jnp.zeros((1, h_pad), f32).at[0, :hidden].set(b1.astype(f32))
    w2_p = jnp.zeros((h_pad, a_pad), cdt).at[:hidden, :nb_action].set(w2.astype(cdt))
    b2_p = jnp.zeros((1, a_pad), f32).at[0, :nb_action].set(b2.astype(f32))

    grid = (b_pad // tb,)

    out = pl.pallas_call(
        mlp_kernel,
        out_shape=jax.ShapeDtypeStruct((b_pad, a_pad), f32),
        grid=grid,
        in_specs=[
            # streamed activations: one batch tile per grid step
            pl.BlockSpec((tb, d_in), lambda i: (i, 0)),
            # resident parameters: same block every step (stay in VMEM)
            pl.BlockSpec((d_in, h_pad), lambda i: (0, 0)),
            pl.BlockSpec((1, h_pad), lambda i: (0, 0)),
            pl.BlockSpec((h_pad, a_pad), lambda i: (0, 0)),
            pl.BlockSpec((1, a_pad), lambda i: (0, 0)),
        ],
        out_specs=pl.BlockSpec((tb, a_pad), lambda i: (i, 0)),
        compiler_params=pltpu.CompilerParams(
            dimension_semantics=("parallel",),
        ),
    )(x_p, w1_p, b1_p, w2_p, b2_p)

    return out[:B, :nb_action]


def _reference(state, w1, b1, w2, b2, compute_dtype=jnp.bfloat16):
    """Pure-JAX reference mirroring the kernel's bf16-in / f32-accumulate math."""
    f32 = jnp.float32
    xb = state.astype(compute_dtype).astype(f32)
    w1b = w1.astype(compute_dtype).astype(f32)
    w2b = w2.astype(compute_dtype).astype(f32)
    h = jnp.maximum(xb @ w1b + b1, 0.0)
    h = h.astype(compute_dtype).astype(f32)
    return h @ w2b + b2


if __name__ == "__main__":
    # Small shapes consistent with the module: input_size=8, nb_action=4, batch=2.
    input_size = 8
    nb_action = 4
    hidden = 30

    key = jax.random.PRNGKey(0)
    k_x, k_w1, k_b1, k_w2, k_b2, k_x2 = jax.random.split(key, 6)

    bound1 = 1.0 / (input_size ** 0.5)
    bound2 = 1.0 / (hidden ** 0.5)
    w1 = jax.random.uniform(k_w1, (input_size, hidden), jnp.float32, -bound1, bound1)
    b1 = jax.random.uniform(k_b1, (hidden,), jnp.float32, -bound1, bound1)
    w2 = jax.random.uniform(k_w2, (hidden, nb_action), jnp.float32, -bound2, bound2)
    b2 = jax.random.uniform(k_b2, (nb_action,), jnp.float32, -bound2, bound2)

    # Case 1: tiny per-step batch (single grid step after padding).
    batch = 2
    state = jax.random.normal(k_x, (batch, input_size), jnp.float32)
    q = jax.block_until_ready(network_forward(state, w1, b1, w2, b2))
    ref = _reference(state, w1, b1, w2, b2)
    assert q.shape == (batch, nb_action)
    assert jnp.allclose(q, ref, atol=1e-3, rtol=1e-3)

    # Case 2: batched (training-path) forward exercising the multi-tile grid.
    batch2 = 300  # not a multiple of the 256-row tile -> padded to 512, grid=(2,)
    state2 = jax.random.normal(k_x2, (batch2, input_size), jnp.float32)
    q2 = jax.block_until_ready(network_forward(state2, w1, b1, w2, b2))
    ref2 = _reference(state2, w1, b1, w2, b2)
    assert q2.shape == (batch2, nb_action)
    assert jnp.allclose(q2, ref2, atol=1e-3, rtol=1e-3)

    print("KERNEL_OK")
</pallas_src>

<mosaic_0001>
module attributes {stable_mosaic.version = 11 : i64} {
  func.func @mlp_kernel(%arg0: i32, %arg1: memref<16x8xbf16, #tpu.memory_space<vmem>>, %arg2: memref<8x128xbf16, #tpu.memory_space<vmem>>, %arg3: memref<1x128xf32, #tpu.memory_space<vmem>>, %arg4: memref<128x128xbf16, #tpu.memory_space<vmem>>, %arg5: memref<1x128xf32, #tpu.memory_space<vmem>>, %arg6: memref<16x128xf32, #tpu.memory_space<vmem>>) attributes {dimension_semantics = [#tpu.dimension_semantics<parallel>], iteration_bounds = array<i64: 1>, scalar_prefetch = 0 : i64, scratch_operands = 0 : i64, tpu.core_type = #tpu.core_type<tc>, window_params = [{transform_indices = @transform_0, window_bounds = array<i64: 16, 8>}, {pipeline_mode = #tpu.pipeline_mode<synchronous>, transform_indices = @transform_1, window_bounds = array<i64: 8, 128>}, {pipeline_mode = #tpu.pipeline_mode<synchronous>, transform_indices = @transform_2, window_bounds = array<i64: 1, 128>}, {pipeline_mode = #tpu.pipeline_mode<synchronous>, transform_indices = @transform_3, window_bounds = array<i64: 128, 128>}, {pipeline_mode = #tpu.pipeline_mode<synchronous>, transform_indices = @transform_4, window_bounds = array<i64: 1, 128>}, {transform_indices = @transform_5, window_bounds = array<i64: 16, 128>}]} {
    %c0 = arith.constant 0 : index
    %c0_0 = arith.constant 0 : index
    %0 = vector.load %arg1[%c0, %c0_0] : memref<16x8xbf16, #tpu.memory_space<vmem>>, vector<16x8xbf16>
    %c0_1 = arith.constant 0 : index
    %c0_2 = arith.constant 0 : index
    %1 = vector.load %arg2[%c0_1, %c0_2] : memref<8x128xbf16, #tpu.memory_space<vmem>>, vector<8x128xbf16>
    %cst = arith.constant dense<0.000000e+00> : vector<16x128xf32>
    %2 = tpu.matmul %0, %1, %cst {dimension_numbers = #tpu.dot_dimension_numbers<[1], [0], [0], [1], [0, 0, 1, 1], [], []>} : vector<16x8xbf16>, vector<8x128xbf16>, vector<16x128xf32> -> vector<16x128xf32>
    %c0_3 = arith.constant 0 : index
    %c0_4 = arith.constant 0 : index
    %3 = vector.load %arg3[%c0_3, %c0_4] : memref<1x128xf32, #tpu.memory_space<vmem>>, vector<1x128xf32>
    %4 = vector.broadcast %3 : vector<1x128xf32> to vector<16x128xf32>
    %5 = arith.addf %2, %4 : vector<16x128xf32>
    %cst_5 = arith.constant 0.000000e+00 : f32
    %6 = vector.broadcast %cst_5 : f32 to vector<16x128xf32>
    %7 = arith.maximumf %5, %6 : vector<16x128xf32>
    %8 = arith.truncf %7 : vector<16x128xf32> to vector<16x128xbf16>
    %c0_6 = arith.constant 0 : index
    %c0_7 = arith.constant 0 : index
    %9 = vector.load %arg4[%c0_6, %c0_7] : memref<128x128xbf16, #tpu.memory_space<vmem>>, vector<128x128xbf16>
    %cst_8 = arith.constant dense<0.000000e+00> : vector<16x128xf32>
    %10 = tpu.matmul %8, %9, %cst_8 {dimension_numbers = #tpu.dot_dimension_numbers<[1], [0], [0], [1], [0, 0, 1, 1], [], []>} : vector<16x128xbf16>, vector<128x128xbf16>, vector<16x128xf32> -> vector<16x128xf32>
    %c0_9 = arith.constant 0 : index
    %c0_10 = arith.constant 0 : index
    %11 = vector.load %arg5[%c0_9, %c0_10] : memref<1x128xf32, #tpu.memory_space<vmem>>, vector<1x128xf32>
    %12 = vector.broadcast %11 : vector<1x128xf32> to vector<16x128xf32>
    %13 = arith.addf %10, %12 : vector<16x128xf32>
    %c0_11 = arith.constant 0 : index
    %c0_12 = arith.constant 0 : index
    %14 = vector.load %arg6[%c0_11, %c0_12] : memref<16x128xf32, #tpu.memory_space<vmem>>, vector<16x128xf32>
    tpu.vector_store %arg6[%c0_11, %c0_12], %13 {strides = array<i32>} : memref<16x128xf32, #tpu.memory_space<vmem>>, vector<16x128xf32>,
    return
  }
  func.func @transform_0(%arg0: i32) -> (i32, i32) {
    %c0_i32 = arith.constant 0 : i32
    %c0_i32_0 = arith.constant 0 : i32
    return %arg0, %c0_i32 : i32, i32
  }
  func.func @transform_1(%arg0: i32) -> (i32, i32) {
    %c0_i32 = arith.constant 0 : i32
    %c0_i32_0 = arith.constant 0 : i32
    %c0_i32_1 = arith.constant 0 : i32
    return %c0_i32, %c0_i32_0 : i32, i32
  }
  func.func @transform_2(%arg0: i32) -> (i32, i32) {
    %c0_i32 = arith.constant 0 : i32
    %c0_i32_0 = arith.constant 0 : i32
    %c0_i32_1 = arith.constant 0 : i32
    return %c0_i32, %c0_i32_0 : i32, i32
  }
  func.func @transform_3(%arg0: i32) -> (i32, i32) {
    %c0_i32 = arith.constant 0 : i32
    %c0_i32_0 = arith.constant 0 : i32
    %c0_i32_1 = arith.constant 0 : i32
    return %c0_i32, %c0_i32_0 : i32, i32
  }
  func.func @transform_4(%arg0: i32) -> (i32, i32) {
    %c0_i32 = arith.constant 0 : i32
    %c0_i32_0 = arith.constant 0 : i32
    %c0_i32_1 = arith.constant 0 : i32
    return %c0_i32, %c0_i32_0 : i32, i32
  }
  func.func @transform_5(%arg0: i32) -> (i32, i32) {
    %c0_i32 = arith.constant 0 : i32
    %c0_i32_0 = arith.constant 0 : i32
    return %arg0, %c0_i32 : i32, i32
  }
}

</mosaic_0001>

<bundles_post_ra>
// kernel: tpu_custom_call.1
= control target key start
LH: loop header
LB: loop body
LE: loop exit
PB: predicated region body
PF: predicated region fallthrough
CT: control target
= control target key end

     0   :  { %10 = vsyncpa [#allocation3], 0  ;;  %s400_s0 = inlined_call_operand.vmem [shape: bf16[16,8], index: 0, kind: input, shape index: {}]   ;;  %s401_s1 = inlined_call_operand.vmem [shape: bf16[8,128], index: 1, kind: input, shape index: {}]   ;;  %s402_s2 = inlined_call_operand.vmem [shape: f32[1,128], index: 2, kind: input, shape index: {}]   ;;  %s403_s3 = inlined_call_operand.hbm [shape: bf16[128,128], index: 3, kind: input, shape index: {}]   ;;  %s404_s4 = inlined_call_operand.vmem [shape: f32[1,128], index: 4, kind: input, shape index: {}]   ;;  %s405_s5 = inlined_call_operand.hbm [shape: f32[16,128], index: 5, kind: output, shape index: {}]  }
   0x1   :  { %11 = vsyncpa [#allocation4], 0  ;;  %s344_s18 = smov [#allocation2]  }
   0x2   :  { %s23_s19 = sshll.u32 %s344_s18, 4  ;;  %s24_s19 = int_to_ptr.vmem [resolvable:$true] %s23_s19 }
   0x3   :  { %s308_s20 = scalar_lea.vmem %s24_s19, 1024  ;;  %p313_p1 = scmp.lt.s32.totalorder %s24_s19, %s24_s19 }
   0x4   :  { %p309_p0 = scmp.ne.s32.totalorder %s24_s19, %s308_s20  ;;  %p314_p2 = scmp.lt.s32.totalorder %s308_s20, %s308_s20 }
   0x6   :  { %p315_p3 = por %p314_p2, %p313_p1 }
   0x8   :  { %p316_p4 = pnand %p315_p3, %p309_p0 }
   0xa   :  { %319 = shalt.err (!%p316_p4)
}
   0xb   :  { %s345_s21 = smov 64   ;;  %s346_s22 = smov 4  }
   0xc   :  { %29 = dma.hbm_to_vmem [thread:$0]  %s403_s3, 1024, %s24_s19, [#allocation3], %s345_s21, %s345_s21, %s346_s22  }
   0xd   :  { %340 = dma.done.wait [#allocation3], 1024  }
   0xe   :  { %341 = vsyncadd [#allocation3], 4294966272  ;;  %v347_v0 = vmov 0.0   ;;  %vm348_vm0 = vmmov 0   ;;  %vm55_vm1 = vcmask 1043456   ;;  %v291_v3 = vld [vmem:[%s400_s0] sm:$0xff]  }
   0xf   :  { %257 = vmatprep.subr.bf16.mxu0 %v347_v0  ;;  %259 = vmatprep.mubr.msk.bf16.mxu0 %vm348_vm0, %v347_v0  ;;  %v38_v1 = vld [vmem:[%s401_s1] sm:$0xf]  ;;  %vm51_vm2 = vcmask 64512   ;;  %v292_v4 = vld [vmem:[#allocation2 + $0x38] sm:$0xff]   ;;  %v293_v5 = vld [vmem:[#allocation2 + $0x30] sm:$0xff]   ;;  %s349_s30 = smov [#allocation5]  }
  0x10   :  { %263 = vmatprep.subr.bf16.mxu1 %v347_v0  ;;  %279 = vmatprep.mubr.msk.bf16.mxu1 %vm348_vm0, %v347_v0  ;;  %v57_v2 = vsel %vm55_vm1, %v38_v1, 0  ;;  %v294_v6 = vld [vmem:[#allocation2 + $0x28] sm:$0xff]   ;;  %v295_v7 = vld [vmem:[#allocation2 + $0x20] sm:$0xff]   ;;  %v296_v8 = vld [vmem:[#allocation2 + $0x18] sm:$0xff]   ;;  %s222_s6 = sshll.u32 %s349_s30, 4  ;;  %s223_s6 = int_to_ptr.vmem [resolvable:$true] %s222_s6 }
  0x11   :  { %258 = vmatpush3.bf16.msra.mxu0 %v57_v2  ;;  %264 = vmatpush3.bf16.msra.mxu1 %v292_v4  ;;  %v297_v9 = vld [vmem:[#allocation2 + $0x10] sm:$0xff]   ;;  %v298_v10 = vld [vmem:[#allocation2 + $0x8] sm:$0xff]   ;;  %v299_v11 = vld [vmem:[#allocation2] sm:$0xff]   ;;  %p325_p6 = scmp.lt.s32.totalorder %s223_s6, %s223_s6 }
  0x12   :  { %265 = vmatprep.subr.bf16.mxu1 %v347_v0  ;;  %v234_v12 = vld [vmem:[%s402_s2] ss:$0 sm:$0xff]  ;;  %s320_s2 = scalar_lea.vmem %s223_s6, 256 }
  0x13   :  { %v237_v22 = vld [vmem:[%s404_s4] ss:$0 sm:$0xff]  ;;  %p321_p5 = scmp.ne.s32.totalorder %s223_s6, %s320_s2  ;;  %p326_p7 = scmp.lt.s32.totalorder %s320_s2, %s320_s2 }
  0x14   :  { %260 = vmatmul.mubr.msk.bf16.vlgmr.msra.gmra.mxu0 %vm51_vm2, %v291_v3 }
  0x15   :  { %266 = vmatpush3.bf16.msra.mxu1 %v293_v5  ;;  %p327_p8 = por %p326_p7, %p325_p6 }
  0x16   :  { %267 = vmatprep.subr.bf16.mxu1 %v347_v0 }
  0x17   :  { %p328_p9 = pnand %p327_p8, %p321_p5 }
  0x19   :  { %268 = vmatpush3.bf16.msra.mxu1 %v294_v6 }
  0x1a   :  { %269 = vmatprep.subr.bf16.mxu1 %v347_v0 }
  0x1d   :  { %270 = vmatpush3.bf16.msra.mxu1 %v295_v7 }
  0x1e   :  { %271 = vmatprep.subr.bf16.mxu1 %v347_v0 }
  0x21   :  { %272 = vmatpush3.bf16.msra.mxu1 %v296_v8 }
  0x22   :  { %273 = vmatprep.subr.bf16.mxu1 %v347_v0 }
  0x25   :  { %274 = vmatpush3.bf16.msra.mxu1 %v297_v9 }
  0x26   :  { %275 = vmatprep.subr.bf16.mxu1 %v347_v0 }
  0x29   :  { %276 = vmatpush3.bf16.msra.mxu1 %v298_v10 }
  0x2a   :  { %277 = vmatprep.subr.bf16.mxu1 %v347_v0 }
  0x2d   :  { %278 = vmatpush3.bf16.msra.mxu1 %v299_v11 }
  0xd4   :  { %v93_v13 = vpop.f32.mrf.mxu0 }
  0xd5   :  { %v94_v15 = vadd.f32 %v234_v12, %v93_v13 }
  0xd6   :  { %v261_v14 = vpop.f32.mrf.mxu0 }
  0xd7   :  { %v100_v19 = vmax.f32 %v94_v15, 0.0 }
  0xd8   :  { %v96_v16 = vpop.f32.mrf.mxu0 }
  0xd9   :  { %v97_v17 = vadd.f32 %v234_v12, %v96_v16 }
  0xda   :  { %v262_v18 = vpop.f32.mrf.mxu0 }
  0xdb   :  { %v101_v20 = vmax.f32 %v97_v17, 0.0 }
  0xdd   :  { %v102_v21 = vpack.c.bf16 %v101_v20, %v100_v19 }
  0xdf   :  { %280 = vmatmul.mubr.bf16.vlgmr.msra.gmra.mxu1 %v102_v21 }
 0x19f   :  { %v208_v23 = vpop.f32.mrf.mxu1 }
 0x1a0   :  { %v209_v24 = vadd.f32 %v237_v22, %v208_v23 }
 0x1a1   :  { %v281_v25 = vpop.f32.mrf.mxu1 }
 0x1a2   :  { %215 = vst [vmem:[#allocation5] sm:$0xff] %v209_v24 }
 0x1a3   :  { %v211_v26 = vpop.f32.mrf.mxu1 }
 0x1a4   :  { %v212_v27 = vadd.f32 %v237_v22, %v211_v26 }
 0x1a5   :  { %v282_v28 = vpop.f32.mrf.mxu1 }
 0x1a6   :  { %216 = vst [vmem:[#allocation5 + $0x8] sm:$0xff] %v212_v27 }
 0x1a7   :  { %331 = shalt.err (!%p328_p9)
}
 0x1a8   :  { %s350_s7 = smov 128   ;;  %s351_s4 = smov 8  }
 0x1a9   :  { %228 = dma.vmem_to_hbm [thread:$0]  %s223_s6, 256, %s405_s5, [#allocation4], %s350_s7, %s350_s7, %s351_s4  }
 0x1aa   :  { %342 = dma.done.wait [#allocation4], 256  }
 0x1ab   :  { %343 = vsyncadd [#allocation4], 4294967040 }
 0x1ac   :  { %232 = vsyncpa [#allocation3], 1 }
 0x1ad   :  { %233 = vsyncpa [#allocation4], 1 }

</bundles_post_ra>
